<compile_context>
chip_gen: v7x
topology: tpu7x:2x2x1
jax: 0.10.0
libtpu: 0.0.40
codegen_flags: <defaults>
</compile_context>

<pallas_src>
import math
from functools import partial

import jax
import jax.numpy as jnp
from jax.experimental import pallas as pl
from jax.experimental.pallas import tpu as pltpu


def _round_up(x, m):
    return ((x + m - 1) // m) * m


def _critic_kernel(x_ref, w1_ref, w2_ref, consts_ref, o_ref):
    """One batch tile: x (TB, Din) -> out (TB, 1).

    consts_ref (8, Hmax) f32 packs: row0 = b1 (first H1 lanes), row1 = b2,
    row2 = w3 row, row3[0] = b3.
    """
    H1 = w1_ref.shape[1]
    H2 = w2_ref.shape[1]

    b1 = consts_ref[0:1, :H1]        # (1, H1)
    b2 = consts_ref[1:2, :H2]        # (1, H2)
    w3 = consts_ref[2:3, :H2]        # (1, H2)
    b3 = consts_ref[3:4, 0:1]        # (1, 1)

    # Layer 1: single fused matmul (MXU), f32 accumulation.
    h1 = jnp.dot(x_ref[...], w1_ref[...],
                 preferred_element_type=jnp.float32) + b1
    h1 = jnp.maximum(h1, 0.0)

    # Layer 2.
    h2 = jnp.dot(h1.astype(w2_ref.dtype), w2_ref[...],
                 preferred_element_type=jnp.float32) + b2
    h2 = jnp.maximum(h2, 0.0)

    # Layer 3 (out_features == 1): VPU multiply + XLU lane reduction.
    out = jnp.sum(h2 * w3, axis=-1, keepdims=True) + b3
    o_ref[...] = out.astype(o_ref.dtype)


def critic_forward(state, action, goal, params, *, tile_b=1024,
                   dtype=jnp.bfloat16):
    """Pallas implementation of Critic.forward(state, action, goal).

    params = (w1, b1, w2, b2, w3_row, b3) with w1 of shape (S+A+G, H1).
    `dtype` is the matmul-operand dtype (bf16 default: halves HBM traffic and
    avoids f32 MXU emulation); all accumulation / bias / ReLU math is f32.
    """
    w1, b1, w2, b2, w3_row, b3 = params
    B, S = state.shape
    A = action.shape[1]
    G = goal.shape[1]
    Din = S + A + G
    assert Din == w1.shape[0], (
        f"state({S}) + action({A}) + goal({G}) = {Din} != W1 rows {w1.shape[0]}")
    H1 = w1.shape[1]
    H2 = w2.shape[1]

    # Fused input (wrapper concat is ~B*Din*4 bytes -- negligible) + operand casts.
    x = jnp.concatenate([state, action, goal], axis=-1).astype(dtype)
    w1 = w1.astype(dtype)
    w2 = w2.astype(dtype)

    # Pack small resident operands into one (8, Hmax) f32 constant.
    Hmax = max(H1, H2)
    consts = jnp.zeros((8, Hmax), jnp.float32)
    consts = consts.at[0, :H1].set(b1.reshape(H1).astype(jnp.float32))
    consts = consts.at[1, :H2].set(b2.reshape(H2).astype(jnp.float32))
    consts = consts.at[2, :H2].set(w3_row.reshape(H2).astype(jnp.float32))
    consts = consts.at[3, 0].set(jnp.float32(b3.reshape(())))

    # Batch tile: multiple of 8, at most tile_b.  For large batches keep >=2 grid
    # steps so the "parallel" axis can shard across both v7x TensorCores.
    TB = _round_up(min(tile_b, _round_up(B, 8)), 8)
    if B >= 512 and pl.cdiv(B, TB) < 2:
        TB = _round_up(pl.cdiv(B, 2), 8)
    n_tiles = pl.cdiv(B, TB)
    B_pad = n_tiles * TB
    if B_pad != B:
        # Padded rows produce ReLU(b1)-propagated garbage; sliced off at the end.
        x = jnp.pad(x, ((0, B_pad - B), (0, 0)))

    # Rough VMEM need; only raise the scoped limit when actually required
    # (v5e default 16 MiB, v7x physical 64 MiB).
    itm = jnp.dtype(dtype).itemsize
    vmem_est = (2 * TB * Din * itm                       # input, double-buffered
                + 2 * TB * 4                              # output
                + 2 * (Din * H1 + H1 * H2) * itm          # resident weights
                + 2 * 8 * Hmax * 4                        # packed consts
                + 2 * TB * (H1 + H2) * 4)                 # f32 h1/h2 temporaries
    cp_kwargs = dict(dimension_semantics=("parallel",))
    if vmem_est > 8 * 1024 * 1024:
        cp_kwargs["vmem_limit_bytes"] = int(
            min(max(2 * vmem_est, 24 * 1024 * 1024), 56 * 1024 * 1024))

    const = lambda shape: pl.BlockSpec(shape, lambda i: (0, 0))  # stays resident

    out = pl.pallas_call(
        _critic_kernel,
        out_shape=jax.ShapeDtypeStruct((B_pad, 1), jnp.float32),
        grid=(n_tiles,),
        in_specs=[
            pl.BlockSpec((TB, Din), lambda i: (i, 0)),   # fused input tile
            const((Din, H1)),                            # W1 (fused)
            const((H1, H2)),                             # W2
            const((8, Hmax)),                            # packed b1/b2/w3/b3
        ],
        out_specs=pl.BlockSpec((TB, 1), lambda i: (i, 0)),
        compiler_params=pltpu.CompilerParams(**cp_kwargs),
    )(x, w1, w2, consts)

    return out[:B]


def init_critic_params(key, state_dim, action_dim, hidden_dims=(256, 256)):
    """nn.Linear-style init (U[-1/sqrt(fan_in), 1/sqrt(fan_in)])."""
    # TODO(synk): kernel implements the default 2-hidden-layer Critic only.
    assert len(hidden_dims) == 2, "kernel implements the default 2-hidden-layer Critic"
    din = 2 * state_dim + action_dim
    h1, h2 = hidden_dims

    def linear(k, fan_in, fan_out):
        kw, kb = jax.random.split(k)
        bound = 1.0 / math.sqrt(fan_in)
        w = jax.random.uniform(kw, (fan_in, fan_out), jnp.float32, -bound, bound)
        b = jax.random.uniform(kb, (1, fan_out), jnp.float32, -bound, bound)
        return w, b

    k1, k2, k3 = jax.random.split(key, 3)
    w1, b1 = linear(k1, din, h1)
    w2, b2 = linear(k2, h1, h2)
    w3, b3 = linear(k3, h2, 1)
    return (w1, b1, w2, b2, w3.T, b3)     # w3 as a (1, h2) row


def critic_reference(state, action, goal, params):
    """Plain-JAX reference with the original (concat + 3x Linear) semantics."""
    w1, b1, w2, b2, w3_row, b3 = params
    x = jnp.concatenate([state, action, goal], axis=-1)
    hp = jax.lax.Precision.HIGHEST
    h = jnp.maximum(jnp.dot(x, w1, precision=hp) + b1, 0.0)
    h = jnp.maximum(jnp.dot(h, w2, precision=hp) + b2, 0.0)
    return jnp.dot(h, w3_row.T, precision=hp) + b3


if __name__ == "__main__":
    key = jax.random.PRNGKey(0)
    batch, state_dim, action_dim = 128, 16, 8
    hidden_dims = (256, 256)    # matches the PyTorch module default

    k_s, k_a, k_g, k_p = jax.random.split(key, 4)
    state = jax.random.normal(k_s, (batch, state_dim), jnp.float32)
    action = jax.random.normal(k_a, (batch, action_dim), jnp.float32)
    goal = jax.random.normal(k_g, (batch, state_dim), jnp.float32)

    params = init_critic_params(k_p, state_dim, action_dim, hidden_dims)
    ref = critic_reference(state, action, goal, params)

    # Default bf16 operands, small tile so the grid has 2 pipelined steps.
    out = critic_forward(state, action, goal, params, tile_b=64)
    jax.block_until_ready(out)
    assert out.shape == (batch, 1)
    assert jnp.allclose(out, ref, atol=5e-2, rtol=5e-2)

    # Batch not a multiple of the tile (exercises the padding path).
    out_odd = critic_forward(state[:100], action[:100], goal[:100], params,
                             tile_b=64)
    jax.block_until_ready(out_odd)
    assert out_odd.shape == (100, 1)
    assert jnp.allclose(out_odd, ref[:100], atol=5e-2, rtol=5e-2)

    # f32-operand fallback path (single grid step).
    out_f32 = critic_forward(state, action, goal, params, dtype=jnp.float32)
    jax.block_until_ready(out_f32)
    assert jnp.allclose(out_f32, ref, atol=2e-2, rtol=2e-2)

    print("KERNEL_OK")
</pallas_src>

<mosaic_0001>
module attributes {stable_mosaic.version = 11 : i64} {
  func.func @_critic_kernel(%arg0: i32, %arg1: memref<64x40xbf16, #tpu.memory_space<vmem>>, %arg2: memref<40x256xbf16, #tpu.memory_space<vmem>>, %arg3: memref<256x256xbf16, #tpu.memory_space<vmem>>, %arg4: memref<8x256xf32, #tpu.memory_space<vmem>>, %arg5: memref<64x1xf32, #tpu.memory_space<vmem>>) attributes {dimension_semantics = [#tpu.dimension_semantics<parallel>], iteration_bounds = array<i64: 2>, scalar_prefetch = 0 : i64, scratch_operands = 0 : i64, tpu.core_type = #tpu.core_type<tc>, window_params = [{transform_indices = @transform_0, window_bounds = array<i64: 64, 40>}, {pipeline_mode = #tpu.pipeline_mode<synchronous>, transform_indices = @transform_1, window_bounds = array<i64: 40, 256>}, {pipeline_mode = #tpu.pipeline_mode<synchronous>, transform_indices = @transform_2, window_bounds = array<i64: 256, 256>}, {pipeline_mode = #tpu.pipeline_mode<synchronous>, transform_indices = @transform_3, window_bounds = array<i64: 8, 256>}, {transform_indices = @transform_4, window_bounds = array<i64: 64, 1>}]} {
    %c0 = arith.constant 0 : index
    %c0_0 = arith.constant 0 : index
    %0 = vector.load %arg4[%c0, %c0_0] : memref<8x256xf32, #tpu.memory_space<vmem>>, vector<1x256xf32>
    %c1 = arith.constant 1 : index
    %c0_1 = arith.constant 0 : index
    %1 = vector.load %arg4[%c1, %c0_1] : memref<8x256xf32, #tpu.memory_space<vmem>>, vector<1x256xf32>
    %c2 = arith.constant 2 : index
    %c0_2 = arith.constant 0 : index
    %2 = vector.load %arg4[%c2, %c0_2] : memref<8x256xf32, #tpu.memory_space<vmem>>, vector<1x256xf32>
    %c3 = arith.constant 3 : index
    %c0_3 = arith.constant 0 : index
    %3 = vector.load %arg4[%c3, %c0_3] : memref<8x256xf32, #tpu.memory_space<vmem>>, vector<1x1xf32>
    %c0_4 = arith.constant 0 : index
    %c0_5 = arith.constant 0 : index
    %4 = vector.load %arg1[%c0_4, %c0_5] : memref<64x40xbf16, #tpu.memory_space<vmem>>, vector<64x40xbf16>
    %c0_6 = arith.constant 0 : index
    %c0_7 = arith.constant 0 : index
    %5 = vector.load %arg2[%c0_6, %c0_7] : memref<40x256xbf16, #tpu.memory_space<vmem>>, vector<40x256xbf16>
    %cst = arith.constant dense<0.000000e+00> : vector<64x256xf32>
    %6 = tpu.matmul %4, %5, %cst {dimension_numbers = #tpu.dot_dimension_numbers<[1], [0], [0], [1], [0, 0, 1, 1], [], []>} : vector<64x40xbf16>, vector<40x256xbf16>, vector<64x256xf32> -> vector<64x256xf32>
    %7 = vector.broadcast %0 : vector<1x256xf32> to vector<64x256xf32>
    %8 = arith.addf %6, %7 : vector<64x256xf32>
    %cst_8 = arith.constant 0.000000e+00 : f32
    %9 = vector.broadcast %cst_8 : f32 to vector<64x256xf32>
    %10 = arith.maximumf %8, %9 : vector<64x256xf32>
    %11 = arith.truncf %10 : vector<64x256xf32> to vector<64x256xbf16>
    %c0_9 = arith.constant 0 : index
    %c0_10 = arith.constant 0 : index
    %12 = vector.load %arg3[%c0_9, %c0_10] : memref<256x256xbf16, #tpu.memory_space<vmem>>, vector<256x256xbf16>
    %cst_11 = arith.constant dense<0.000000e+00> : vector<64x256xf32>
    %13 = tpu.matmul %11, %12, %cst_11 {dimension_numbers = #tpu.dot_dimension_numbers<[1], [0], [0], [1], [0, 0, 1, 1], [], []>} : vector<64x256xbf16>, vector<256x256xbf16>, vector<64x256xf32> -> vector<64x256xf32>
    %14 = vector.broadcast %1 : vector<1x256xf32> to vector<64x256xf32>
    %15 = arith.addf %13, %14 : vector<64x256xf32>
    %cst_12 = arith.constant 0.000000e+00 : f32
    %16 = vector.broadcast %cst_12 : f32 to vector<64x256xf32>
    %17 = arith.maximumf %15, %16 : vector<64x256xf32>
    %18 = vector.broadcast %2 : vector<1x256xf32> to vector<64x256xf32>
    %19 = arith.mulf %17, %18 : vector<64x256xf32>
    %cst_13 = arith.constant dense<0.000000e+00> : vector<64xf32>
    %20 = vector.multi_reduction <add>, %19, %cst_13 [1] : vector<64x256xf32> to vector<64xf32>
    %21 = vector.shape_cast %20 : vector<64xf32> to vector<64x1xf32>
    %22 = vector.broadcast %3 : vector<1x1xf32> to vector<64x1xf32>
    %23 = arith.addf %21, %22 : vector<64x1xf32>
    %c0_14 = arith.constant 0 : index
    %c0_15 = arith.constant 0 : index
    %24 = vector.load %arg5[%c0_14, %c0_15] : memref<64x1xf32, #tpu.memory_space<vmem>>, vector<64x1xf32>
    tpu.vector_store %arg5[%c0_14, %c0_15], %23 {strides = array<i32>} : memref<64x1xf32, #tpu.memory_space<vmem>>, vector<64x1xf32>,
    return
  }
  func.func @transform_0(%arg0: i32) -> (i32, i32) {
    %c0_i32 = arith.constant 0 : i32
    %c0_i32_0 = arith.constant 0 : i32
    return %arg0, %c0_i32 : i32, i32
  }
  func.func @transform_1(%arg0: i32) -> (i32, i32) {
    %c0_i32 = arith.constant 0 : i32
    %c0_i32_0 = arith.constant 0 : i32
    %c0_i32_1 = arith.constant 0 : i32
    return %c0_i32, %c0_i32_0 : i32, i32
  }
  func.func @transform_2(%arg0: i32) -> (i32, i32) {
    %c0_i32 = arith.constant 0 : i32
    %c0_i32_0 = arith.constant 0 : i32
    %c0_i32_1 = arith.constant 0 : i32
    return %c0_i32, %c0_i32_0 : i32, i32
  }
  func.func @transform_3(%arg0: i32) -> (i32, i32) {
    %c0_i32 = arith.constant 0 : i32
    %c0_i32_0 = arith.constant 0 : i32
    %c0_i32_1 = arith.constant 0 : i32
    return %c0_i32, %c0_i32_0 : i32, i32
  }
  func.func @transform_4(%arg0: i32) -> (i32, i32) {
    %c0_i32 = arith.constant 0 : i32
    %c0_i32_0 = arith.constant 0 : i32
    return %arg0, %c0_i32 : i32, i32
  }
}

</mosaic_0001>

<bundles_post_ra>
// kernel: tpu_custom_call.1
= control target key start
LH: loop header
LB: loop body
LE: loop exit
PB: predicated region body
PF: predicated region fallthrough
CT: control target
= control target key end

     0   :  { %9 = vsyncpa [#allocation3], 0  ;;  %s1082_s15 = smov 0   ;;  %s1240_s0 = inlined_call_operand.vmem [shape: bf16[128,40], index: 0, kind: input, shape index: {}]   ;;  %s1241_s1 = inlined_call_operand.vmem [shape: bf16[40,256], index: 1, kind: input, shape index: {}]   ;;  %s1242_s2 = inlined_call_operand.hbm [shape: bf16[256,256], index: 2, kind: input, shape index: {}]   ;;  %s1243_s3 = inlined_call_operand.vmem [shape: f32[8,256], index: 3, kind: input, shape index: {}]   ;;  %s1244_s4 = inlined_call_operand.vmem [shape: f32[128,1], index: 4, kind: output, shape index: {}]  }
   0x1 LB: > { %s837_s16 = sadd.s32 4294967295, %s1051_s15   ;;  %p839_p0 = scmp.ge.s32.totalorder %s1051_s15, 1  ;;  %s1051_s15 = sphi %s1082_s15, %s15_s15  }
   0x2   : > { %p135_p1 = scmp.lt.s32.totalorder %s1051_s15, 3  ;;  %s1053_s17 = smov [#allocation2]  }
   0x3   : > { %s150_s18 = sshll.u32 %s1053_s17, 4  ;;  %p1096_p3 = scmp.eq.s32.totalorder %s837_s16, 0  ;;  %s151_s18 = int_to_ptr.vmem [resolvable:$true] %s150_s18 }
   0x4   : > { %p1090_p2 = pnand %p839_p0, %p135_p1  ;;  %s1013_s24 = scalar_lea.hbm %s1242_s2, 4096 }
   0x5   : > { %s1249_s20 = scalar_select %p1096_p3, 1, 0 }
   0x6   : > { %s1248_s19 = scalar_select %p1090_p2, 1, 0 }
   0x7   : > { %p935_p4 = pneg %p1090_p2  ;;  %p1014_p6 = scmp.ne.s32.totalorder %s1242_s2, %s1013_s24 }
   0x8   : > { %p1020_p10 = scmp.lt.u32.totalorder %s1013_s24, %s1242_s2 }
   0x9   : > { %p1104_p5 = pnand %p1096_p3, %p935_p4 }
   0xb   : > { %p1015_p7 = pneg %p1104_p5 }
   0xd   : > { %p1016_p8 = pnand %p1015_p7, %p1014_p6 }
   0xf   : > { %p1017_p9 = pneg %p1016_p8 }
  0x11   : > { %p1022_p11 = pnand %p1020_p10, %p1017_p9 }
  0x13   : > { %1025 = shalt.err (!%p1022_p11)
}
  0x14   : > { %s1026_s29 = scalar_lea.vmem %s151_s18, 4096  ;;  %p1034_p1 = scmp.lt.s32.totalorder %s151_s18, %s151_s18 }
  0x15   : > { %p1027_p12 = scmp.ne.s32.totalorder %s151_s18, %s1026_s29  ;;  %p1035_p4 = scmp.lt.s32.totalorder %s1026_s29, %s1026_s29 }
  0x17   : > { %p1029_p13 = pnand %p1027_p12, %p1015_p7  ;;  %p1036_p3 = por %p1035_p4, %p1034_p1 }
  0x19   : > { %p1030_p0 = pneg %p1029_p13 }
  0x1b   : > { %p1037_p2 = pnand %p1036_p3, %p1030_p0 }
  0x1d   : > { %1040 = shalt.err (!%p1037_p2)
}
  0x1e   : > { %s1054_s30 = smov 128   ;;  %s1055_s5 = smov 8  }
  0x1f   : > { %938 = dma.hbm_to_vmem [thread:$0]  (!%p1104_p5), %s1242_s2, 4096, %s151_s18, [#allocation3], %s1054_s30, %s1054_s30, %s1055_s5  }
  0x20   : > { %p1251_p6 = scmp.ne.s32.totalorder %s1248_s19, 0 }
  0x21   : > { %p1252_p8 = scmp.ne.s32.totalorder (!%p1251_p6), %s1249_s20, 0 }
  0x22   : > { %178 = sbr.rel (%p1251_p6) target bundleno = 669 (0x29d), region = 36 }
  0x29   : > { %1046 = dma.done.wait (%p1252_p8), [#allocation3], 4096  }
  0x2a   : > { %1048 = vsyncadd (%p1252_p8), [#allocation3], 4294963200  ;;  %s844_s8 = sshll.u32 %s837_s16, 3  ;;  %v1056_v0 = vmov 0   ;;  %v953_v1 = vld [vmem:[%s1241_s1 + $0x4] ss:$8 sps:$4 sm:$0xff]   ;;  %v237_v45 = vlaneseq }
  0x2b   : > { %344 = vmatprep.mubr.bf16.mxu0 %v1056_v0  ;;  %p205_p2 = scmp.lt.s32.totalorder %s844_s8, 15  ;;  %v955_v2 = vld [vmem:[%s1241_s1] ss:$8 sps:$4 sm:$0xff]   ;;  %312 = vmatprep.subr.bf16.mxu0 %v953_v1  ;;  %v956_v3 = vld [vmem:[%s1241_s1 + $0x14] ss:$8 sps:$4 sm:$0xff]   ;;  %vm305_vm0 = vcmask 1043456  }
  0x2c   : > { %v235_v4 = vld [vmem:[%s1241_s1 + $0x20] sm:$0xff]  ;;  %313 = vmatpush1.bf16.msra.mxu0 %v955_v2  ;;  %v958_v5 = vld [vmem:[%s1241_s1 + $0x10] ss:$8 sps:$4 sm:$0xff]   ;;  %v970_v12 = vld [vmem:[#allocation2 + $0x14] ss:$8 sps:$4 sm:$0xff]   ;;  %vm292_vm1 = vcmask 326656  }
  0x2d   : > { %s1254_s8 = smov (!%p205_p2, %s844_s8), 15  ;;  %314 = vmatprep.subr.bf16.mxu0 %v956_v3  ;;  %v859_v6 = vcombine.high %v235_v4, %v235_v4  ;;  %v858_v7 = vcombine.low %v235_v4, %v235_v4  ;;  %v967_v9 = vld [vmem:[#allocation2 + $0x4] ss:$8 sps:$4 sm:$0xff]   ;;  %v965_v10 = vld [vmem:[#allocation2] ss:$8 sps:$4 sm:$0xff]   ;;  %v238_v46 = vshrl.u32 %v237_v45, 7 }
  0x2e   : > { %s845_s9 = sshll.u32 %s1254_s8, 2  ;;  %899 = vmatprep.subr.bf16.mxu1 %v967_v9  ;;  %v968_v13 = vld [vmem:[#allocation2 + $0x10] ss:$8 sps:$4 sm:$0xff]   ;;  %v973_v14 = vld [vmem:[#allocation2 + $0x24] ss:$8 sps:$4 sm:$0xff]   ;;  %s847_s30 = sshll.u32 %s1254_s8, 3 }
  0x2f   : > { %s1150_s21 = scalar_lea.vmem %s1240_s0, %s845_s9  ;;  %v307_v8 = vsel %vm305_vm0, %v858_v7, 0  ;;  %915 = vmatpush1.bf16.msra.mxu1 %v965_v10  ;;  %v971_v16 = vld [vmem:[#allocation2 + $0x20] ss:$8 sps:$4 sm:$0xff]   ;;  %v976_v17 = vld [vmem:[#allocation2 + $0x34] ss:$8 sps:$4 sm:$0xff]   ;;  %v1163_v47 = vsub.s32 0, %v238_v46  ;;  %s214_s10 = scalar_lea.vmem %s1244_s4, %s847_s30 }
  0x30   : > { %315 = vmatpush1.bf16.msra.mxu0 %v958_v5  ;;  %v961_v11 = vld [vmem:[%s1150_s21] sm:$0xff]   ;;  %900 = vmatprep.subr.bf16.mxu1 %v970_v12  ;;  %v962_v15 = vld [vmem:[%s1150_s21 + $0x8] sm:$0xff]   ;;  %v974_v18 = vld [vmem:[#allocation2 + $0x30] ss:$8 sps:$4 sm:$0xff]   ;;  %v1168_v49 = vsub.s32 1, %v238_v46  ;;  %vm760_vm2 = vcmask 7168  }
  0x31   : > { %860 = vmatprep.subr.msk.bf16.mxu0 %vm305_vm0, %v859_v6  ;;  %v979_v19 = vld [vmem:[#allocation2 + $0x44] ss:$8 sps:$4 sm:$0xff]   ;;  %v963_v20 = vld [vmem:[%s1150_s21 + $0x10] sm:$0xff]   ;;  %v977_v21 = vld [vmem:[#allocation2 + $0x40] ss:$8 sps:$4 sm:$0xff]  }
  0x32   : > { %v982_v22 = vld [vmem:[#allocation2 + $0x54] ss:$8 sps:$4 sm:$0xff]   ;;  %v980_v23 = vld [vmem:[#allocation2 + $0x50] ss:$8 sps:$4 sm:$0xff]   ;;  %v985_v24 = vld [vmem:[#allocation2 + $0x64] ss:$8 sps:$4 sm:$0xff]  }
  0x33   : > { %916 = vmatpush1.bf16.msra.mxu1 %v968_v13  ;;  %v964_v25 = vld [vmem:[%s1150_s21 + $0x18] sm:$0xff]   ;;  %v983_v26 = vld [vmem:[#allocation2 + $0x60] ss:$8 sps:$4 sm:$0xff]   ;;  %v991_v29 = vld [vmem:[#allocation2 + $0x84] ss:$8 sps:$4 sm:$0xff]  }
  0x34   : > { %317 = vmatpush1.bf16.msra.mxu0 %v307_v8  ;;  %901 = vmatprep.subr.bf16.mxu1 %v973_v14  ;;  %v988_v27 = vld [vmem:[#allocation2 + $0x74] ss:$8 sps:$4 sm:$0xff]   ;;  %v986_v28 = vld [vmem:[#allocation2 + $0x70] ss:$8 sps:$4 sm:$0xff]   ;;  %v989_v30 = vld [vmem:[#allocation2 + $0x80] ss:$8 sps:$4 sm:$0xff]  }
  0x35   : > { %612 = vmatprep.subr.bf16.mxu0 %v967_v9  ;;  %v994_v31 = vld [vmem:[#allocation2 + $0x94] ss:$8 sps:$4 sm:$0xff]   ;;  %v992_v32 = vld [vmem:[#allocation2 + $0x90] ss:$8 sps:$4 sm:$0xff]   ;;  %v997_v33 = vld [vmem:[#allocation2 + $0xa4] ss:$8 sps:$4 sm:$0xff]  }
  0x36   : > { %v995_v34 = vld [vmem:[#allocation2 + $0xa0] ss:$8 sps:$4 sm:$0xff]   ;;  %v1000_v35 = vld [vmem:[#allocation2 + $0xb4] ss:$8 sps:$4 sm:$0xff]   ;;  %v998_v36 = vld [vmem:[#allocation2 + $0xb0] ss:$8 sps:$4 sm:$0xff]  }
  0x37   : > { %861 = vmatmul.mubr.msk.bf16.vlgmr.msra.gmra.mrb[0].mxu0 %vm292_vm1, %v961_v11  ;;  %917 = vmatpush1.bf16.msra.mxu1 %v971_v16  ;;  %v1003_v37 = vld [vmem:[#allocation2 + $0xc4] ss:$8 sps:$4 sm:$0xff]   ;;  %v1001_v38 = vld [vmem:[#allocation2 + $0xc0] ss:$8 sps:$4 sm:$0xff]   ;;  %v1006_v39 = vld [vmem:[#allocation2 + $0xd4] ss:$8 sps:$4 sm:$0xff]  }
  0x38   : > { %354 = vmatprep.mubr.bf16.mxu0 %v1056_v0  ;;  %613 = vmatpush1.bf16.msra.mxu0 %v965_v10  ;;  %v1004_v40 = vld [vmem:[#allocation2 + $0xd0] ss:$8 sps:$4 sm:$0xff]   ;;  %v1009_v41 = vld [vmem:[#allocation2 + $0xe4] ss:$8 sps:$4 sm:$0xff]   ;;  %v1007_v42 = vld [vmem:[#allocation2 + $0xe0] ss:$8 sps:$4 sm:$0xff]  }
  0x39   : > { %614 = vmatprep.subr.bf16.mxu0 %v970_v12  ;;  %902 = vmatprep.subr.bf16.mxu1 %v976_v17  ;;  %v1012_v43 = vld [vmem:[#allocation2 + $0xf4] ss:$8 sps:$4 sm:$0xff]   ;;  %v1010_v44 = vld [vmem:[#allocation2 + $0xf0] ss:$8 sps:$4 sm:$0xff]  }
  0x3a   : > { %v217_v48 = vld [vmem:[%s1243_s3] ss:$8 sm:$0x3] }
  0x3b   : > { %918 = vmatpush1.bf16.msra.mxu1 %v974_v18  ;;  %v240_v50 = vrot.slane %v217_v48, %v1163_v47  ;;  %v244_v51 = vrot.slane %v217_v48, %v1168_v49  ;;  %v849_v48 = vld [vmem:[%s1243_s3 + $0x2] ss:$8 sm:$0x3] }
  0x3c   : > { %615 = vmatpush1.bf16.msra.mxu0 %v968_v13  ;;  %903 = vmatprep.subr.bf16.mxu1 %v979_v19 }
  0x3d   : > { %616 = vmatprep.subr.bf16.mxu0 %v973_v14 }
  0x3f   : > { %862 = vmatmul.mubr.msk.bf16.gmra.mrb[4].mxu0 %vm292_vm1, %v962_v15  ;;  %919 = vmatpush1.bf16.msra.mxu1 %v977_v21 }
  0x40   : > { %364 = vmatprep.mubr.bf16.mxu0 %v1056_v0  ;;  %617 = vmatpush1.bf16.msra.mxu0 %v971_v16 }
  0x41   : > { %618 = vmatprep.subr.bf16.mxu0 %v976_v17  ;;  %904 = vmatprep.subr.bf16.mxu1 %v982_v22 }
  0x43   : > { %920 = vmatpush1.bf16.msra.mxu1 %v980_v23 }
  0x44   : > { %619 = vmatpush1.bf16.msra.mxu0 %v974_v18  ;;  %905 = vmatprep.subr.bf16.mxu1 %v985_v24 }
  0x45   : > { %620 = vmatprep.subr.bf16.mxu0 %v979_v19 }
  0x47   : > { %863 = vmatmul.mubr.msk.bf16.gmra.mrb[8].mxu0 %vm292_vm1, %v963_v20  ;;  %921 = vmatpush1.bf16.msra.mxu1 %v983_v26 }
  0x48   : > { %374 = vmatprep.mubr.bf16.mxu0 %v1056_v0  ;;  %621 = vmatpush1.bf16.msra.mxu0 %v977_v21 }
  0x49   : > { %622 = vmatprep.subr.bf16.mxu0 %v982_v22  ;;  %906 = vmatprep.subr.bf16.mxu1 %v988_v27 }
  0x4b   : > { %922 = vmatpush1.bf16.msra.mxu1 %v986_v28 }
  0x4c   : > { %623 = vmatpush1.bf16.msra.mxu0 %v980_v23  ;;  %907 = vmatprep.subr.bf16.mxu1 %v991_v29 }
  0x4d   : > { %624 = vmatprep.subr.bf16.mxu0 %v985_v24 }
  0x4f   : > { %864 = vmatmul.mubr.msk.bf16.gmra.mrb[12].mxu0 %vm292_vm1, %v964_v25  ;;  %923 = vmatpush1.bf16.msra.mxu1 %v989_v30 }
  0x50   : > { %625 = vmatpush1.bf16.msra.mxu0 %v983_v26  ;;  %908 = vmatprep.subr.bf16.mxu1 %v994_v31 }
  0x51   : > { %626 = vmatprep.subr.bf16.mxu0 %v988_v27 }
  0x53   : > { %924 = vmatpush1.bf16.msra.mxu1 %v992_v32 }
  0x54   : > { %627 = vmatpush1.bf16.msra.mxu0 %v986_v28  ;;  %909 = vmatprep.subr.bf16.mxu1 %v997_v33 }
  0x55   : > { %628 = vmatprep.subr.bf16.mxu0 %v991_v29 }
  0x57   : > { %925 = vmatpush1.bf16.msra.mxu1 %v995_v34 }
  0x58   : > { %629 = vmatpush1.bf16.msra.mxu0 %v989_v30  ;;  %910 = vmatprep.subr.bf16.mxu1 %v1000_v35 }
  0x59   : > { %630 = vmatprep.subr.bf16.mxu0 %v994_v31 }
  0x5b   : > { %926 = vmatpush1.bf16.msra.mxu1 %v998_v36 }
  0x5c   : > { %631 = vmatpush1.bf16.msra.mxu0 %v992_v32  ;;  %911 = vmatprep.subr.bf16.mxu1 %v1003_v37 }
  0x5d   : > { %632 = vmatprep.subr.bf16.mxu0 %v997_v33 }
  0x5f   : > { %927 = vmatpush1.bf16.msra.mxu1 %v1001_v38 }
  0x60   : > { %633 = vmatpush1.bf16.msra.mxu0 %v995_v34  ;;  %912 = vmatprep.subr.bf16.mxu1 %v1006_v39 }
  0x61   : > { %634 = vmatprep.subr.bf16.mxu0 %v1000_v35 }
  0x63   : > { %928 = vmatpush1.bf16.msra.mxu1 %v1004_v40 }
  0x64   : > { %635 = vmatpush1.bf16.msra.mxu0 %v998_v36  ;;  %913 = vmatprep.subr.bf16.mxu1 %v1009_v41 }
  0x65   : > { %636 = vmatprep.subr.bf16.mxu0 %v1003_v37 }
  0x67   : > { %929 = vmatpush1.bf16.msra.mxu1 %v1007_v42 }
  0x68   : > { %637 = vmatpush1.bf16.msra.mxu0 %v1001_v38  ;;  %914 = vmatprep.subr.bf16.mxu1 %v1012_v43 }
  0x69   : > { %638 = vmatprep.subr.bf16.mxu0 %v1006_v39 }
  0x6b   : > { %930 = vmatpush1.bf16.msra.mxu1 %v1010_v44 }
  0x6c   : > { %639 = vmatpush1.bf16.msra.mxu0 %v1004_v40 }
  0x6d   : > { %640 = vmatprep.subr.bf16.mxu0 %v1009_v41 }
  0x70   : > { %641 = vmatpush1.bf16.msra.mxu0 %v1007_v42 }
  0x71   : > { %642 = vmatprep.subr.bf16.mxu0 %v1012_v43 }
  0x74   : > { %643 = vmatpush1.bf16.msra.mxu0 %v1010_v44  ;;  %v848_v44 = vld [vmem:[%s1243_s3 + $0x1] ss:$8 sm:$0x3] }
  0x75   : > { %v1176_v45 = vrot.slane %v848_v44, %v1163_v47  ;;  %v1179_v46 = vrot.slane %v848_v44, %v1168_v49 }
 0x10a   : > { %v346_v52 = vpop.f32.mrb[0].mxu0 }
 0x10b   : > { %v347_v53 = vadd.f32 %v346_v52, %v240_v50  ;;  %v348_v54 = vpop.f32.mrb[1].mxu0 }
 0x10c   : > { %v349_v55 = vadd.f32 %v348_v54, %v244_v51  ;;  %v350_v56 = vpop.f32.mrb[2].mxu0 }
 0x10d   : > { %v351_v57 = vadd.f32 %v350_v56, %v240_v50  ;;  %v352_v58 = vpop.f32.mrb[3].mxu0  ;;  %v385_v60 = vmax.f32 %v347_v53, 0.0  ;;  %v1186_v53 = vrot.slane %v849_v48, %v1163_v47  ;;  %v1190_v56 = vrot.slane %v849_v48, %v1168_v49 }
 0x10e   : > { %v353_v59 = vadd.f32 %v352_v58, %v244_v51  ;;  %v386_v62 = vmax.f32 %v349_v55, 0.0 }
 0x10f   : > { %v387_v61 = vmax.f32 %v351_v57, 0.0 }
 0x110   : > { %v388_v63 = vmax.f32 %v353_v59, 0.0 }
 0x111   : > { %v401_v0 = vpack.c.bf16 %v387_v61, %v385_v60 }
 0x112   : > { %v402_v1 = vpack.c.bf16 %v388_v63, %v386_v62  ;;  %v356_v2 = vpop.f32.mrb[4].mxu0 }
 0x113   : > { %v357_v3 = vadd.f32 %v356_v2, %v240_v50  ;;  %v358_v4 = vpop.f32.mrb[5].mxu0 }
 0x114   : > { %v359_v5 = vadd.f32 %v358_v4, %v244_v51  ;;  %v360_v6 = vpop.f32.mrb[6].mxu0  ;;  %644 = vmatprep.mubr.bf16.mxu0 %v402_v1 }
 0x115   : > { %v361_v7 = vadd.f32 %v360_v6, %v240_v50  ;;  %v362_v8 = vpop.f32.mrb[7].mxu0  ;;  %645 = vmatmul.mubr.bf16.vlgmr.msra.gmra.mrb[16].mxu0 %v401_v0  ;;  %v389_v10 = vmax.f32 %v357_v3, 0.0 }
 0x116   : > { %v363_v9 = vadd.f32 %v362_v8, %v244_v51  ;;  %v390_v12 = vmax.f32 %v359_v5, 0.0 }
 0x117   : > { %v391_v11 = vmax.f32 %v361_v7, 0.0 }
 0x118   : > { %v392_v13 = vmax.f32 %v363_v9, 0.0 }
 0x119   : > { %v403_v14 = vpack.c.bf16 %v391_v11, %v389_v10 }
 0x11a   : > { %v366_v15 = vpop.f32.mrb[8].mxu0  ;;  %v404_v16 = vpack.c.bf16 %v392_v13, %v390_v12 }
 0x11b   : > { %v367_v17 = vadd.f32 %v366_v15, %v240_v50  ;;  %v368_v18 = vpop.f32.mrb[9].mxu0 }
 0x11c   : > { %v369_v19 = vadd.f32 %v368_v18, %v244_v51  ;;  %v370_v20 = vpop.f32.mrb[10].mxu0  ;;  %654 = vmatprep.mubr.bf16.mxu1 %v404_v16 }
 0x11d   : > { %v371_v21 = vadd.f32 %v370_v20, %v240_v50  ;;  %v372_v22 = vpop.f32.mrb[11].mxu0  ;;  %655 = vmatmul.mubr.bf16.vlgmr.msra.gmra.mrb[0].mxu1 %v403_v14  ;;  %v393_v24 = vmax.f32 %v367_v17, 0.0 }
 0x11e   : > { %v373_v23 = vadd.f32 %v372_v22, %v244_v51  ;;  %v394_v26 = vmax.f32 %v369_v19, 0.0 }
 0x11f   : > { %v395_v25 = vmax.f32 %v371_v21, 0.0 }
 0x120   : > { %v396_v27 = vmax.f32 %v373_v23, 0.0 }
 0x121   : > { %v405_v28 = vpack.c.bf16 %v395_v25, %v393_v24 }
 0x122   : > { %v406_v29 = vpack.c.bf16 %v396_v27, %v394_v26  ;;  %v376_v30 = vpop.f32.mrb[12].mxu0 }
 0x123   : > { %v377_v31 = vadd.f32 %v376_v30, %v240_v50  ;;  %v378_v32 = vpop.f32.mrb[13].mxu0 }
 0x124   : > { %v379_v33 = vadd.f32 %v378_v32, %v244_v51  ;;  %v380_v34 = vpop.f32.mrb[14].mxu0  ;;  %664 = vmatprep.mubr.bf16.mxu1 %v406_v29 }
 0x125   : > { %v381_v35 = vadd.f32 %v380_v34, %v240_v50  ;;  %v382_v36 = vpop.f32.mrb[15].mxu0  ;;  %665 = vmatmul.mubr.bf16.gmra.mrb[4].mxu1 %v405_v28  ;;  %v397_v38 = vmax.f32 %v377_v31, 0.0 }
 0x126   : > { %v383_v37 = vadd.f32 %v382_v36, %v244_v51  ;;  %v398_v40 = vmax.f32 %v379_v33, 0.0 }
 0x127   : > { %v399_v39 = vmax.f32 %v381_v35, 0.0 }
 0x128   : > { %v400_v41 = vmax.f32 %v383_v37, 0.0 }
 0x129   : > { %v407_v42 = vpack.c.bf16 %v399_v39, %v397_v38 }
 0x12a   : > { %v408_v43 = vpack.c.bf16 %v400_v41, %v398_v40 }
 0x12c   : > { %674 = vmatprep.mubr.bf16.mxu1 %v408_v43 }
 0x12d   : > { %675 = vmatmul.mubr.bf16.gmra.mrb[8].mxu1 %v407_v42 }
 0x1e8   : > { %v646_v50 = vpop.f32.mrb[16].mxu0 }
 0x1e9   : > { %v647_v51 = vadd.f32 %v646_v50, %v1176_v45  ;;  %v648_v52 = vpop.f32.mrb[17].mxu0 }
 0x1ea   : > { %v649_v54 = vadd.f32 %v648_v52, %v1179_v46  ;;  %v650_v55 = vpop.f32.mrb[18].mxu0 }
 0x1eb   : > { %v685_v57 = vmax.f32 %v647_v51, 0.0  ;;  %v651_v58 = vadd.f32 %v650_v55, %v1176_v45  ;;  %v652_v59 = vpop.f32.mrb[19].mxu0 }
 0x1ec   : > { %v686_v60 = vmax.f32 %v649_v54, 0.0  ;;  %v653_v61 = vadd.f32 %v652_v59, %v1179_v46 }
 0x1ed   : > { %v687_v62 = vmax.f32 %v651_v58, 0.0  ;;  %v712_v63 = vmul.f32 %v1186_v53, %v685_v57 }
 0x1ee   : > { %v688_v0 = vmax.f32 %v653_v61, 0.0  ;;  %v713_v47 = vmul.f32 %v1190_v56, %v686_v60 }
 0x1ef   : > { %v714_v1 = vmul.f32 %v1186_v53, %v687_v62 }
 0x1f0   : > { %v715_v2 = vmul.f32 %v1190_v56, %v688_v0  ;;  %v656_v3 = vpop.f32.mrb[0].mxu1  ;;  %v728_v49 = vadd.f32 %v713_v47, %v712_v63 }
 0x1f1   : > { %v657_v4 = vadd.f32 %v656_v3, %v1176_v45  ;;  %v658_v5 = vpop.f32.mrb[1].mxu1 }
 0x1f2   : > { %v659_v6 = vadd.f32 %v658_v5, %v1179_v46  ;;  %v660_v7 = vpop.f32.mrb[2].mxu1  ;;  %729 = vadd.xlane.f32.xlu0 %v728_v49  ;;  %v731_v8 = vadd.f32 %v715_v2, %v714_v1 }
 0x1f3   : > { %v689_v9 = vmax.f32 %v657_v4, 0.0  ;;  %v661_v10 = vadd.f32 %v660_v7, %v1176_v45  ;;  %v662_v11 = vpop.f32.mrb[3].mxu1 }
 0x1f4   : > { %v690_v12 = vmax.f32 %v659_v6, 0.0  ;;  %v663_v13 = vadd.f32 %v662_v11, %v1179_v46 }
 0x1f5   : > { %v691_v14 = vmax.f32 %v661_v10, 0.0  ;;  %v716_v15 = vmul.f32 %v1186_v53, %v689_v9 }
 0x1f6   : > { %v692_v16 = vmax.f32 %v663_v13, 0.0  ;;  %732 = vadd.xlane.f32.xlu0 %v731_v8  ;;  %v717_v17 = vmul.f32 %v1190_v56, %v690_v12 }
 0x1f7   : > { %v718_v18 = vmul.f32 %v1186_v53, %v691_v14 }
 0x1f8   : > { %v719_v19 = vmul.f32 %v1190_v56, %v692_v16  ;;  %v666_v20 = vpop.f32.mrb[4].mxu1  ;;  %v734_v21 = vadd.f32 %v717_v17, %v716_v15 }
 0x1f9   : > { %v667_v22 = vadd.f32 %v666_v20, %v1176_v45  ;;  %v668_v23 = vpop.f32.mrb[5].mxu1 }
 0x1fa   : > { %v669_v24 = vadd.f32 %v668_v23, %v1179_v46  ;;  %v670_v25 = vpop.f32.mrb[6].mxu1  ;;  %735 = vadd.xlane.f32.xlu1 %v734_v21  ;;  %v737_v26 = vadd.f32 %v719_v19, %v718_v18 }
 0x1fb   : > { %v693_v27 = vmax.f32 %v667_v22, 0.0  ;;  %v671_v28 = vadd.f32 %v670_v25, %v1176_v45  ;;  %v672_v29 = vpop.f32.mrb[7].mxu1 }
 0x1fc   : > { %v694_v30 = vmax.f32 %v669_v24, 0.0  ;;  %v673_v31 = vadd.f32 %v672_v29, %v1179_v46 }
 0x1fd   : > { %v720_v32 = vmul.f32 %v1186_v53, %v693_v27  ;;  %v695_v33 = vmax.f32 %v671_v28, 0.0 }
 0x1fe   : > { %v721_v34 = vmul.f32 %v1190_v56, %v694_v30  ;;  %v696_v35 = vmax.f32 %v673_v31, 0.0  ;;  %738 = vadd.xlane.f32.xlu1 %v737_v26 }
 0x1ff   : > { %v722_v36 = vmul.f32 %v1186_v53, %v695_v33 }
 0x200   : > { %v723_v37 = vmul.f32 %v1190_v56, %v696_v35  ;;  %v676_v38 = vpop.f32.mrb[8].mxu1  ;;  %v740_v39 = vadd.f32 %v721_v34, %v720_v32 }
 0x201   : > { %v677_v40 = vadd.f32 %v676_v38, %v1176_v45  ;;  %v678_v41 = vpop.f32.mrb[9].mxu1 }
 0x202   : > { %v679_v42 = vadd.f32 %v678_v41, %v1179_v46  ;;  %v680_v43 = vpop.f32.mrb[10].mxu1  ;;  %741 = vadd.xlane.f32.xlu0 %v740_v39  ;;  %v743_v44 = vadd.f32 %v723_v37, %v722_v36 }
 0x203   : > { %v697_v48 = vmax.f32 %v677_v40, 0.0  ;;  %v681_v50 = vadd.f32 %v680_v43, %v1176_v45  ;;  %v682_v51 = vpop.f32.mrb[11].mxu1  ;;  %v222_v45 = vld [vmem:[%s1243_s3 + $0x3] ss:$0 sm:$0xff] }
 0x204   : > { %v698_v52 = vmax.f32 %v679_v42, 0.0  ;;  %v683_v54 = vadd.f32 %v682_v51, %v1179_v46  ;;  %744 = vadd.xlane.f32.xlu1 %v743_v44 }
 0x205   : > { %v724_v55 = vmul.f32 %v1186_v53, %v697_v48  ;;  %v699_v57 = vmax.f32 %v681_v50, 0.0 }
 0x206   : > { %v725_v58 = vmul.f32 %v1190_v56, %v698_v52  ;;  %v700_v59 = vmax.f32 %v683_v54, 0.0 }
 0x207   : > { %v726_v60 = vmul.f32 %v1186_v53, %v699_v57 }
 0x208   : > { %v727_v61 = vmul.f32 %v1190_v56, %v700_v59  ;;  %v746_v62 = vadd.f32 %v725_v58, %v724_v55 }
 0x20a   : > { %747 = vadd.xlane.f32.xlu0 %v746_v62  ;;  %v749_v63 = vadd.f32 %v727_v61, %v726_v60 }
 0x20c   : > { %750 = vadd.xlane.f32.xlu1 %v749_v63 }
 0x27f   : > { %v730_v46 = vpop.xlane.xlu0 %729 }
 0x280   : > { %v752_v0 = vadd.f32 %v730_v46, %v222_v45 }
 0x282   : > { %761 = vst.msk [vmem:[%s214_s10] sm:$0xff] %vm760_vm2, %v752_v0 }
 0x283   : > { %v733_v53 = vpop.xlane.xlu0 %732 }
 0x284   : > { %v753_v56 = vadd.f32 %v733_v53, %v222_v45 }
 0x286   : > { %762 = vst.msk [vmem:[%s214_s10 + $0x8] sm:$0xff] %vm760_vm2, %v753_v56 }
 0x287   : > { %v736_v47 = vpop.xlane.xlu1 %735 }
 0x288   : > { %v754_v1 = vadd.f32 %v736_v47, %v222_v45 }
 0x28a   : > { %763 = vst.msk [vmem:[%s214_s10 + $0x10] sm:$0xff] %vm760_vm2, %v754_v1 }
 0x28b   : > { %v739_v2 = vpop.xlane.xlu1 %738 }
 0x28c   : > { %v755_v3 = vadd.f32 %v739_v2, %v222_v45 }
 0x28e   : > { %764 = vst.msk [vmem:[%s214_s10 + $0x18] sm:$0xff] %vm760_vm2, %v755_v3 }
 0x28f   : > { %v742_v49 = vpop.xlane.xlu0 %741 }
 0x290   : > { %v756_v4 = vadd.f32 %v742_v49, %v222_v45 }
 0x291   : > { %v745_v5 = vpop.xlane.xlu1 %744 }
 0x292   : > { %765 = vst.msk [vmem:[%s214_s10 + $0x20] sm:$0xff] %vm760_vm2, %v756_v4  ;;  %v757_v6 = vadd.f32 %v745_v5, %v222_v45 }
 0x294   : > { %766 = vst.msk [vmem:[%s214_s10 + $0x28] sm:$0xff] %vm760_vm2, %v757_v6 }
 0x297   : > { %v748_v7 = vpop.xlane.xlu0 %747 }
 0x298   : > { %v758_v8 = vadd.f32 %v748_v7, %v222_v45 }
 0x299   : > { %v751_v9 = vpop.xlane.xlu1 %750 }
 0x29a   : > { %767 = vst.msk [vmem:[%s214_s10 + $0x30] sm:$0xff] %vm760_vm2, %v758_v8  ;;  %v759_v10 = vadd.f32 %v751_v9, %v222_v45 }
 0x29c   : > { %768 = vst.msk [vmem:[%s214_s10 + $0x38] sm:$0xff] %vm760_vm2, %v759_v10 }
 0x29d PF: > { %s15_s15 = sadd.s32 1, %s1051_s15  }
 0x29e   : > { %p12_p3 = scmp.ge.s32.totalorder %s15_s15, 4  }
 0x2a0   :  { %14 = sbr.rel (!%p12_p3) target bundleno = 1 (0x1), region = 73 }
 0x2a7   :  { %791 = vsyncpa [#allocation3], 1 }
 0x2a8   :  { %793 = vsyncpa [#allocation3 + $0x1], 1 }

</bundles_post_ra>
